<compile_context>
chip_gen: v5e
topology: v5e:2x2
jax: 0.10.0
libtpu: 0.0.40
codegen_flags: <defaults>
</compile_context>

<pallas_src>
import jax
import jax.numpy as jnp
from jax.experimental import pallas as pl
from jax.experimental.pallas import tpu as pltpu

H1, H2 = 512, 256
TB_MAX = 512


def _round_up(x, m):
    return ((x + m - 1) // m) * m


def _cdiv(a, b):
    return (a + b - 1) // b


def _leaky_relu(x, slope=0.2):
    return jnp.where(x > 0, x, slope * x)


def discriminator_mlp_kernel(emb_ref, flat_ref, w1a_ref, w1b_ref, b1_ref,
                             w2_ref, b2_ref, w3_ref, b3_ref, out_ref):
    """One (TB, .) batch tile of the fused 3-layer MLP.

    f32 activations arrive from HBM and are cast to bf16 on the VPU just
    before each MXU matmul; accumulation and all elementwise math (bias add,
    LeakyReLU, sigmoid) stay in f32.
    """
    # Layer 1: split over the [emb | flat] concat so it never materializes.
    flat_bf = flat_ref[...].astype(jnp.bfloat16)
    emb_bf = emb_ref[...].astype(jnp.bfloat16)
    h1 = jnp.dot(flat_bf, w1b_ref[...], preferred_element_type=jnp.float32)
    h1 = h1 + jnp.dot(emb_bf, w1a_ref[...],
                      preferred_element_type=jnp.float32)
    h1 = _leaky_relu(h1 + b1_ref[...])

    # Layer 2: Linear(512, 256) + LeakyReLU(0.2)
    h2 = jnp.dot(h1.astype(jnp.bfloat16), w2_ref[...],
                 preferred_element_type=jnp.float32)
    h2 = _leaky_relu(h2 + b2_ref[...])

    # Layer 3: Linear(256, 1) + Sigmoid as a VPU multiply + XLU lane reduction
    # against the resident (1, 256) weight row -- narrow (TB, 1) writeback.
    logits = jnp.sum(h2 * w3_ref[...], axis=-1, keepdims=True) + b3_ref[...]
    out_ref[...] = jax.nn.sigmoid(logits).astype(out_ref.dtype)


def prepare_params(params, auxiliary):
    """One-time prep (outside the per-call path): split W1 over the concat and
    pre-cast matmul weights to bf16; layer-3 weights stay f32 (VPU path)."""
    return {
        "emb": params["emb"],                                   # (aux, aux) f32
        "w1a": params["w1"][:auxiliary].astype(jnp.bfloat16),   # (aux, 512)
        "w1b": params["w1"][auxiliary:].astype(jnp.bfloat16),   # (F,   512)
        "b1": params["b1"],                                     # (1, 512) f32
        "w2": params["w2"].astype(jnp.bfloat16),                # (512, 256)
        "b2": params["b2"],                                     # (1, 256) f32
        "w3": params["w3"].reshape(1, -1),                      # (1, 256) f32
        "b3": params["b3"],                                     # (1, 1)   f32
    }


@jax.jit
def discriminator_forward(img, labels, p):
    """img: (B, C, H, W) float32, labels: (B,) int32 -> (B, 1) float32."""
    B = img.shape[0]
    aux = p["emb"].shape[0]

    # Embedding gather (data-dependent) stays in plain JAX; flatten is a view.
    emb = jnp.take(p["emb"], labels, axis=0)                   # (B, aux) f32
    flat = img.reshape(B, -1)                                  # (B, F)   f32
    f_dim = flat.shape[1]

    # Adaptive batch tiling: TB multiple of 16 (bf16 sublane packing), capped
    # at TB_MAX, with >=2 grid steps whenever possible so v7x's two
    # TensorCores both get work ("parallel" axis).  Keeps zero-pad waste small.
    b16 = _round_up(max(B, 1), 16)
    n_steps = _cdiv(b16, TB_MAX)
    if n_steps == 1 and b16 >= 32:
        n_steps = 2
    TB = _round_up(_cdiv(b16, n_steps), 16)
    B_pad = TB * n_steps

    if B_pad != B:
        pad = B_pad - B
        emb = jnp.pad(emb, ((0, pad), (0, 0)))
        flat = jnp.pad(flat, ((0, pad), (0, 0)))

    grid = (n_steps,)
    row = lambda n: pl.BlockSpec((TB, n), lambda i: (i, 0))
    resident = lambda r, c: pl.BlockSpec((r, c), lambda i: (0, 0))

    flops = 2 * B_pad * (aux * H1 + f_dim * H1 + H1 * H2 + H2)
    bytes_accessed = (
        4 * B_pad * (aux + f_dim)                         # f32 activations in
        + 2 * (aux * H1 + f_dim * H1 + H1 * H2)           # bf16 weights
        + 4 * (H1 + H2 + H2 + 1)                          # f32 biases + w3 row
        + 4 * B_pad)                                      # f32 (B_pad, 1) out
    cost = pl.CostEstimate(flops=flops,
                           transcendentals=B_pad,         # sigmoid exp
                           bytes_accessed=bytes_accessed)

    out = pl.pallas_call(
        discriminator_mlp_kernel,
        out_shape=jax.ShapeDtypeStruct((B_pad, 1), jnp.float32),
        grid=grid,
        in_specs=[
            row(aux),                 # emb tile        (TB, aux)   f32
            row(f_dim),               # flat img tile   (TB, F)     f32
            resident(aux, H1),        # W1[:aux]        VMEM-resident bf16
            resident(f_dim, H1),      # W1[aux:]        VMEM-resident bf16
            resident(1, H1),          # b1              f32
            resident(H1, H2),         # W2              bf16
            resident(1, H2),          # b2              f32
            resident(1, H2),          # W3 row          f32 (VPU layer 3)
            resident(1, 1),           # b3              f32
        ],
        out_specs=pl.BlockSpec((TB, 1), lambda i: (i, 0)),
        compiler_params=pltpu.CompilerParams(
            dimension_semantics=("parallel",),       # megacore split on v7x
            vmem_limit_bytes=32 * 1024 * 1024),
        cost_estimate=cost,
    )(emb, flat, p["w1a"], p["w1b"], p["b1"], p["w2"], p["b2"], p["w3"], p["b3"])

    return out[:B]


def init_params(key, image_shape, auxiliary):
    """Deterministic synthetic parameters matching the PyTorch module shapes."""
    d_in = auxiliary + int(jnp.prod(jnp.array(image_shape)))
    ks = jax.random.split(key, 7)
    scale = 0.05
    return {
        "emb": scale * jax.random.normal(ks[0], (auxiliary, auxiliary), jnp.float32),
        "w1": scale * jax.random.normal(ks[1], (d_in, 512), jnp.float32),
        "b1": scale * jax.random.normal(ks[2], (1, 512), jnp.float32),
        "w2": scale * jax.random.normal(ks[3], (512, 256), jnp.float32),
        "b2": scale * jax.random.normal(ks[4], (1, 256), jnp.float32),
        "w3": scale * jax.random.normal(ks[5], (256, 1), jnp.float32),
        "b3": scale * jax.random.normal(ks[6], (1, 1), jnp.float32),
    }


def _reference_forward(img, labels, params):
    """Pure-JAX f32 reference for numerical verification."""
    B = img.shape[0]
    emb = jnp.take(params["emb"], labels, axis=0)
    x = jnp.concatenate([emb, img.reshape(B, -1)], axis=-1)
    h1 = _leaky_relu(x @ params["w1"] + params["b1"])
    h2 = _leaky_relu(h1 @ params["w2"] + params["b2"])
    return jax.nn.sigmoid(h2 @ params["w3"] + params["b3"])


if __name__ == "__main__":
    # Small shapes consistent with the module.
    image_shape = (1, 16, 16)   # (C, H, W)
    auxiliary = 10
    batch = 2

    key = jax.random.PRNGKey(0)
    k_img, k_lbl, k_par = jax.random.split(key, 3)

    img = jax.random.normal(k_img, (batch,) + image_shape, jnp.float32)
    labels = jax.random.randint(k_lbl, (batch,), 0, auxiliary, jnp.int32)
    params = init_params(k_par, image_shape, auxiliary)
    prepared = prepare_params(params, auxiliary)

    out = discriminator_forward(img, labels, prepared)
    out = jax.block_until_ready(out)

    ref = _reference_forward(img, labels, params)
    assert out.shape == (batch, 1), out.shape
    # bf16 matmul operands -> slightly loosened tolerance vs the f32 reference.
    assert jnp.allclose(out, ref, atol=2e-2, rtol=2e-2), (out, ref)

    print("KERNEL_OK")
</pallas_src>

<mosaic_0001>
module attributes {stable_mosaic.version = 11 : i64} {
  func.func @discriminator_mlp_kernel(%arg0: i32, %arg1: memref<16x10xf32, #tpu.memory_space<vmem>>, %arg2: memref<16x256xf32, #tpu.memory_space<vmem>>, %arg3: memref<10x512xbf16, #tpu.memory_space<vmem>>, %arg4: memref<256x512xbf16, #tpu.memory_space<vmem>>, %arg5: memref<1x512xf32, #tpu.memory_space<vmem>>, %arg6: memref<512x256xbf16, #tpu.memory_space<vmem>>, %arg7: memref<1x256xf32, #tpu.memory_space<vmem>>, %arg8: memref<1x256xf32, #tpu.memory_space<vmem>>, %arg9: memref<1x1xf32, #tpu.memory_space<vmem>>, %arg10: memref<16x1xf32, #tpu.memory_space<vmem>>) attributes {dimension_semantics = [#tpu.dimension_semantics<parallel>], iteration_bounds = array<i64: 1>, scalar_prefetch = 0 : i64, scratch_operands = 0 : i64, tpu.core_type = #tpu.core_type<tc>, window_params = [{transform_indices = @transform_0, window_bounds = array<i64: 16, 10>}, {transform_indices = @transform_1, window_bounds = array<i64: 16, 256>}, {pipeline_mode = #tpu.pipeline_mode<synchronous>, transform_indices = @transform_2, window_bounds = array<i64: 10, 512>}, {pipeline_mode = #tpu.pipeline_mode<synchronous>, transform_indices = @transform_3, window_bounds = array<i64: 256, 512>}, {pipeline_mode = #tpu.pipeline_mode<synchronous>, transform_indices = @transform_4, window_bounds = array<i64: 1, 512>}, {pipeline_mode = #tpu.pipeline_mode<synchronous>, transform_indices = @transform_5, window_bounds = array<i64: 512, 256>}, {pipeline_mode = #tpu.pipeline_mode<synchronous>, transform_indices = @transform_6, window_bounds = array<i64: 1, 256>}, {pipeline_mode = #tpu.pipeline_mode<synchronous>, transform_indices = @transform_7, window_bounds = array<i64: 1, 256>}, {pipeline_mode = #tpu.pipeline_mode<synchronous>, transform_indices = @transform_8, window_bounds = array<i64: 1, 1>}, {transform_indices = @transform_9, window_bounds = array<i64: 16, 1>}]} {
    %c0 = arith.constant 0 : index
    %c0_0 = arith.constant 0 : index
    %0 = vector.load %arg2[%c0, %c0_0] : memref<16x256xf32, #tpu.memory_space<vmem>>, vector<16x256xf32>
    %1 = arith.truncf %0 : vector<16x256xf32> to vector<16x256xbf16>
    %c0_1 = arith.constant 0 : index
    %c0_2 = arith.constant 0 : index
    %2 = vector.load %arg1[%c0_1, %c0_2] : memref<16x10xf32, #tpu.memory_space<vmem>>, vector<16x10xf32>
    %3 = arith.truncf %2 : vector<16x10xf32> to vector<16x10xbf16>
    %c0_3 = arith.constant 0 : index
    %c0_4 = arith.constant 0 : index
    %4 = vector.load %arg4[%c0_3, %c0_4] : memref<256x512xbf16, #tpu.memory_space<vmem>>, vector<256x512xbf16>
    %cst = arith.constant dense<0.000000e+00> : vector<16x512xf32>
    %5 = tpu.matmul %1, %4, %cst {dimension_numbers = #tpu.dot_dimension_numbers<[1], [0], [0], [1], [0, 0, 1, 1], [], []>} : vector<16x256xbf16>, vector<256x512xbf16>, vector<16x512xf32> -> vector<16x512xf32>
    %c0_5 = arith.constant 0 : index
    %c0_6 = arith.constant 0 : index
    %6 = vector.load %arg3[%c0_5, %c0_6] : memref<10x512xbf16, #tpu.memory_space<vmem>>, vector<10x512xbf16>
    %cst_7 = arith.constant dense<0.000000e+00> : vector<16x512xf32>
    %7 = tpu.matmul %3, %6, %cst_7 {dimension_numbers = #tpu.dot_dimension_numbers<[1], [0], [0], [1], [0, 0, 1, 1], [], []>} : vector<16x10xbf16>, vector<10x512xbf16>, vector<16x512xf32> -> vector<16x512xf32>
    %8 = arith.addf %5, %7 : vector<16x512xf32>
    %c0_8 = arith.constant 0 : index
    %c0_9 = arith.constant 0 : index
    %9 = vector.load %arg5[%c0_8, %c0_9] : memref<1x512xf32, #tpu.memory_space<vmem>>, vector<1x512xf32>
    %10 = vector.broadcast %9 : vector<1x512xf32> to vector<16x512xf32>
    %11 = arith.addf %8, %10 : vector<16x512xf32>
    %cst_10 = arith.constant 0.000000e+00 : f32
    %12 = vector.broadcast %cst_10 : f32 to vector<16x512xf32>
    %13 = arith.cmpf ogt, %11, %12 : vector<16x512xf32>
    %cst_11 = arith.constant 2.000000e-01 : f32
    %14 = vector.broadcast %cst_11 : f32 to vector<16x512xf32>
    %15 = arith.mulf %14, %11 : vector<16x512xf32>
    %16 = arith.select %13, %11, %15 : vector<16x512xi1>, vector<16x512xf32>
    %17 = arith.truncf %16 : vector<16x512xf32> to vector<16x512xbf16>
    %c0_12 = arith.constant 0 : index
    %c0_13 = arith.constant 0 : index
    %18 = vector.load %arg6[%c0_12, %c0_13] : memref<512x256xbf16, #tpu.memory_space<vmem>>, vector<512x256xbf16>
    %cst_14 = arith.constant dense<0.000000e+00> : vector<16x256xf32>
    %19 = tpu.matmul %17, %18, %cst_14 {dimension_numbers = #tpu.dot_dimension_numbers<[1], [0], [0], [1], [0, 0, 1, 1], [], []>} : vector<16x512xbf16>, vector<512x256xbf16>, vector<16x256xf32> -> vector<16x256xf32>
    %c0_15 = arith.constant 0 : index
    %c0_16 = arith.constant 0 : index
    %20 = vector.load %arg7[%c0_15, %c0_16] : memref<1x256xf32, #tpu.memory_space<vmem>>, vector<1x256xf32>
    %21 = vector.broadcast %20 : vector<1x256xf32> to vector<16x256xf32>
    %22 = arith.addf %19, %21 : vector<16x256xf32>
    %cst_17 = arith.constant 0.000000e+00 : f32
    %23 = vector.broadcast %cst_17 : f32 to vector<16x256xf32>
    %24 = arith.cmpf ogt, %22, %23 : vector<16x256xf32>
    %cst_18 = arith.constant 2.000000e-01 : f32
    %25 = vector.broadcast %cst_18 : f32 to vector<16x256xf32>
    %26 = arith.mulf %25, %22 : vector<16x256xf32>
    %27 = arith.select %24, %22, %26 : vector<16x256xi1>, vector<16x256xf32>
    %c0_19 = arith.constant 0 : index
    %c0_20 = arith.constant 0 : index
    %28 = vector.load %arg8[%c0_19, %c0_20] : memref<1x256xf32, #tpu.memory_space<vmem>>, vector<1x256xf32>
    %29 = vector.broadcast %28 : vector<1x256xf32> to vector<16x256xf32>
    %30 = arith.mulf %27, %29 : vector<16x256xf32>
    %cst_21 = arith.constant dense<0.000000e+00> : vector<16xf32>
    %31 = vector.multi_reduction <add>, %30, %cst_21 [1] : vector<16x256xf32> to vector<16xf32>
    %32 = vector.shape_cast %31 : vector<16xf32> to vector<16x1xf32>
    %c0_22 = arith.constant 0 : index
    %c0_23 = arith.constant 0 : index
    %33 = vector.load %arg9[%c0_22, %c0_23] : memref<1x1xf32, #tpu.memory_space<vmem>>, vector<1x1xf32>
    %34 = vector.broadcast %33 : vector<1x1xf32> to vector<16x1xf32>
    %35 = arith.addf %32, %34 : vector<16x1xf32>
    %36 = arith.negf %35 : vector<16x1xf32>
    %37 = math.exp %36 : vector<16x1xf32>
    %cst_24 = arith.constant 1.000000e+00 : f32
    %38 = vector.broadcast %cst_24 : f32 to vector<16x1xf32>
    %39 = arith.addf %38, %37 : vector<16x1xf32>
    %40 = arith.divf %38, %39 : vector<16x1xf32>
    %c0_25 = arith.constant 0 : index
    %c0_26 = arith.constant 0 : index
    %41 = vector.load %arg10[%c0_25, %c0_26] : memref<16x1xf32, #tpu.memory_space<vmem>>, vector<16x1xf32>
    tpu.vector_store %arg10[%c0_25, %c0_26], %40 {strides = array<i32>} : memref<16x1xf32, #tpu.memory_space<vmem>>, vector<16x1xf32>,
    return
  }
  func.func @transform_0(%arg0: i32) -> (i32, i32) {
    %c0_i32 = arith.constant 0 : i32
    %c0_i32_0 = arith.constant 0 : i32
    return %arg0, %c0_i32 : i32, i32
  }
  func.func @transform_1(%arg0: i32) -> (i32, i32) {
    %c0_i32 = arith.constant 0 : i32
    %c0_i32_0 = arith.constant 0 : i32
    return %arg0, %c0_i32 : i32, i32
  }
  func.func @transform_2(%arg0: i32) -> (i32, i32) {
    %c0_i32 = arith.constant 0 : i32
    %c0_i32_0 = arith.constant 0 : i32
    %c0_i32_1 = arith.constant 0 : i32
    return %c0_i32, %c0_i32_0 : i32, i32
  }
  func.func @transform_3(%arg0: i32) -> (i32, i32) {
    %c0_i32 = arith.constant 0 : i32
    %c0_i32_0 = arith.constant 0 : i32
    %c0_i32_1 = arith.constant 0 : i32
    return %c0_i32, %c0_i32_0 : i32, i32
  }
  func.func @transform_4(%arg0: i32) -> (i32, i32) {
    %c0_i32 = arith.constant 0 : i32
    %c0_i32_0 = arith.constant 0 : i32
    %c0_i32_1 = arith.constant 0 : i32
    return %c0_i32, %c0_i32_0 : i32, i32
  }
  func.func @transform_5(%arg0: i32) -> (i32, i32) {
    %c0_i32 = arith.constant 0 : i32
    %c0_i32_0 = arith.constant 0 : i32
    %c0_i32_1 = arith.constant 0 : i32
    return %c0_i32, %c0_i32_0 : i32, i32
  }
  func.func @transform_6(%arg0: i32) -> (i32, i32) {
    %c0_i32 = arith.constant 0 : i32
    %c0_i32_0 = arith.constant 0 : i32
    %c0_i32_1 = arith.constant 0 : i32
    return %c0_i32, %c0_i32_0 : i32, i32
  }
  func.func @transform_7(%arg0: i32) -> (i32, i32) {
    %c0_i32 = arith.constant 0 : i32
    %c0_i32_0 = arith.constant 0 : i32
    %c0_i32_1 = arith.constant 0 : i32
    return %c0_i32, %c0_i32_0 : i32, i32
  }
  func.func @transform_8(%arg0: i32) -> (i32, i32) {
    %c0_i32 = arith.constant 0 : i32
    %c0_i32_0 = arith.constant 0 : i32
    %c0_i32_1 = arith.constant 0 : i32
    return %c0_i32, %c0_i32_0 : i32, i32
  }
  func.func @transform_9(%arg0: i32) -> (i32, i32) {
    %c0_i32 = arith.constant 0 : i32
    %c0_i32_0 = arith.constant 0 : i32
    return %arg0, %c0_i32 : i32, i32
  }
}

</mosaic_0001>

<bundles_post_ra>
// kernel: discriminator_forward.1
= control target key start
LH: loop header
LB: loop body
LE: loop exit
PB: predicated region body
PF: predicated region fallthrough
CT: control target
= control target key end

     0   :  { %s2201_s0 = inlined_call_operand.vmem [shape: f32[16,10], index: 0, kind: input, shape index: {}]   ;;  %s2202_s1 = inlined_call_operand.vmem [shape: f32[16,256], index: 1, kind: input, shape index: {}]   ;;  %s2203_s2 = inlined_call_operand.vmem [shape: bf16[10,512], index: 2, kind: input, shape index: {}]   ;;  %s2204_s3 = inlined_call_operand.hbm [shape: bf16[256,512], index: 3, kind: input, shape index: {}]   ;;  %s2205_s4 = inlined_call_operand.vmem [shape: f32[1,512], index: 4, kind: input, shape index: {}]   ;;  %s2206_s5 = inlined_call_operand.hbm [shape: bf16[512,256], index: 5, kind: input, shape index: {}]   ;;  %s2207_s6 = inlined_call_operand.vmem [shape: f32[1,256], index: 6, kind: input, shape index: {}]   ;;  %s2208_s7 = inlined_call_operand.vmem [shape: f32[1,256], index: 7, kind: input, shape index: {}]   ;;  %s2209_s8 = inlined_call_operand.<no memory space> [shape: f32[1,1], index: 8, kind: input, shape index: {}]   ;;  %s2210_s9 = inlined_call_operand.vmem [shape: f32[16,1], index: 9, kind: output, shape index: {}]  }
   0x1   :  { %v14_v0 = vstv %s2209_s8 }
   0x2   :  { %15 = vst [vmem:[#allocation2] sm:$0x1] %v14_v0 }
   0x3   :  { %16 = vsyncpa [#allocation4], 0  ;;  %s28_s13 = sshll.u32 %s2204_s3, 4  ;;  %s29_s13 = int_to_ptr.hbm [resolvable:$true] %s28_s13 }
   0x4   :  { %17 = vsyncpa [#allocation6], 0  ;;  %s2027_s14 = smov [#allocation3]   ;;  %s43_s18 = sshll.u32 %s2206_s5, 4  ;;  %s44_s18 = int_to_ptr.hbm [resolvable:$true] %s43_s18 }
   0x5   :  { %s30_s15 = sshll.u32 %s2027_s14, 4  ;;  %s2028_s19 = smov 256   ;;  %s31_s15 = int_to_ptr.vmem [resolvable:$true] %s30_s15 }
   0x6   :  { %s2029_s20 = smov 16   ;;  %s2030_s8 = smov [#allocation5]  }
   0x7   :  { %36 = dma.hbm_to_vmem [thread:$0]  %s29_s13, 8192, %s31_s15, [#allocation4], %s2028_s19, %s2028_s19, %s2029_s20  }
   0x8   :  { %s45_s21 = sshll.u32 %s2030_s8, 4  ;;  %s2031_s22 = smov 128   ;;  %s46_s21 = int_to_ptr.vmem [resolvable:$true] %s45_s21 }
   0x9   :  { %s2032_s23 = smov 8  }
   0xa   :  { %51 = dma.hbm_to_vmem [thread:$0]  %s44_s18, 8192, %s46_s21, [#allocation6], %s2031_s22, %s2031_s22, %s2032_s23  }
   0xb   :  { %2023 = dma.done.wait [#allocation4], 8192  }
   0xc   :  { %2024 = vsyncadd [#allocation4], 4294959104 }
   0xd   :  { %2025 = dma.done.wait [#allocation6], 8192  }
   0xe   :  { %2026 = vsyncadd [#allocation6], 4294959104  ;;  %vm164_vm0 = vcmask 1044480   ;;  %vm160_vm1 = vcmask 80896   ;;  %v1296_v1 = vld [vmem:[%s2203_s2] sm:$0xf] }
   0xf   :  { %v1894_v2 = vld [vmem:[%s2203_s2 + $0xc] sm:$0x10]  ;;  %v1892_v3 = vld [vmem:[%s2203_s2 + $0x4] sm:$0xf]  ;;  %v1298_v5 = vld [vmem:[%s2203_s2 + $0x10] sm:$0x10] }
  0x10   :  { %v1297_v4 = vor.u32 %v1894_v2, %v1296_v1  ;;  %v1304_v6 = vld [vmem:[%s2203_s2 + $0x8] sm:$0xf]  ;;  %v1895_v7 = vld [vmem:[%s2203_s2 + $0x14] sm:$0x10]  ;;  %v1301_v8 = vor.u32 %v1892_v3, %v1298_v5  ;;  %v1893_v10 = vld [vmem:[%s2203_s2 + $0xc] sm:$0xf] }
  0x11   :  { %v1305_v9 = vor.u32 %v1895_v7, %v1304_v6  ;;  %v1306_v11 = vld [vmem:[%s2203_s2 + $0x18] sm:$0x10]  ;;  %v1428_v12 = vld [vmem:[#allocation3 + $0xe0] sm:$0xf]  ;;  %v1858_v15 = vld [vmem:[#allocation3 + $0xec] sm:$0xf0] }
  0x12   :  { %v166_v13 = vsel %vm164_vm0, %v1297_v4, 0  ;;  %v1309_v14 = vor.u32 %v1893_v10, %v1306_v11  ;;  %v1556_v16 = vld [vmem:[#allocation3 + $0x1e0] sm:$0xf]  ;;  %v169_v18 = vsel %vm164_vm0, %v1301_v8, 0  ;;  %v1429_v20 = vor.u32 %v1858_v15, %v1428_v12  ;;  %v1890_v21 = vld [vmem:[#allocation3 + $0x1ec] sm:$0xf0] }
  0x13   :  { %v73_v17 = vld [vmem:[%s2201_s0] sm:$0xff]  ;;  %184 = vmatpush.bf16.msra.mxu0 %v166_v13  ;;  %v172_v19 = vsel %vm164_vm0, %v1305_v9, 0  ;;  %198 = vmatpush.bf16.msra.mxu1 %v169_v18  ;;  %v1557_v24 = vor.u32 %v1890_v21, %v1556_v16  ;;  %v1430_v25 = vld [vmem:[#allocation3 + $0xf0] sm:$0xf0]  ;;  %v74_v27 = vld [vmem:[%s2201_s0 + $0x8] sm:$0xff] }
  0x14   :  { %v1856_v22 = vld [vmem:[#allocation3 + $0xe4] sm:$0xf]  ;;  %212 = vmatpush.bf16.msra.mxu2 %v172_v19  ;;  %v175_v23 = vsel %vm164_vm0, %v1309_v14, 0  ;;  %v1558_v29 = vld [vmem:[#allocation3 + $0x1f0] sm:$0xf0]  ;;  %v75_v32 = vpack.c.bf16 %v74_v27, %v73_v17  ;;  %vm1285_vm0 = vcmask 7168  }
  0x15   :  { %v1888_v26 = vld [vmem:[#allocation3 + $0x1e4] sm:$0xf]  ;;  %226 = vmatpush.bf16.msra.mxu3 %v175_v23  ;;  %v1433_v28 = vor.u32 %v1856_v22, %v1430_v25  ;;  %v1412_v30 = vld [vmem:[#allocation3 + $0xc0] sm:$0xf]  ;;  %v1854_v31 = vld [vmem:[#allocation3 + $0xcc] sm:$0xf0] }
  0x16   :  { %v1561_v33 = vor.u32 %v1888_v26, %v1558_v29  ;;  %v1413_v34 = vor.u32 %v1854_v31, %v1412_v30  ;;  %v1540_v35 = vld [vmem:[#allocation3 + $0x1c0] sm:$0xf]  ;;  %v1886_v36 = vld [vmem:[#allocation3 + $0x1cc] sm:$0xf0]  ;;  %v1852_v37 = vld [vmem:[#allocation3 + $0xc4] sm:$0xf]  ;;  %1310 = vmatmul.msk.bf16.vlgmr.msra.gmra.mxu0 %vm160_vm1, %v75_v32  ;;  %1311 = vmatmul.msk.bf16.vlgmr.msra.gmra.mxu1 %vm160_vm1, %v75_v32 }
  0x17   :  { %553 = vmatpush.bf16.msrb.mxu0 %v1429_v20  ;;  %567 = vmatpush.bf16.msrb.mxu1 %v1557_v24  ;;  %v1541_v38 = vor.u32 %v1886_v36, %v1540_v35  ;;  %v1414_v39 = vld [vmem:[#allocation3 + $0xd0] sm:$0xf0]  ;;  %v1884_v40 = vld [vmem:[#allocation3 + $0x1c4] sm:$0xf]  ;;  %v1396_v44 = vld [vmem:[#allocation3 + $0xa0] sm:$0xf] }
  0x18   :  { %581 = vmatpush.bf16.msrb.mxu2 %v1433_v28  ;;  %v1542_v41 = vld [vmem:[#allocation3 + $0x1d0] sm:$0xf0]  ;;  %v1417_v42 = vor.u32 %v1852_v37, %v1414_v39  ;;  %v1850_v45 = vld [vmem:[#allocation3 + $0xac] sm:$0xf0]  ;;  %v1524_v46 = vld [vmem:[#allocation3 + $0x1a0] sm:$0xf]  ;;  %1313 = vmatmul.msk.bf16.vlgmr.msra.gmra.mxu3 %vm160_vm1, %v75_v32 }
  0x19   :  { %595 = vmatpush.bf16.msrb.mxu3 %v1561_v33  ;;  %v1545_v43 = vor.u32 %v1884_v40, %v1542_v41  ;;  %1312 = vmatmul.msk.bf16.vlgmr.msra.gmra.mxu2 %vm160_vm1, %v75_v32  ;;  %v1397_v47 = vor.u32 %v1850_v45, %v1396_v44  ;;  %v1882_v48 = vld [vmem:[#allocation3 + $0x1ac] sm:$0xf0]  ;;  %v1848_v49 = vld [vmem:[#allocation3 + $0xa4] sm:$0xf]  ;;  %v1398_v50 = vld [vmem:[#allocation3 + $0xb0] sm:$0xf0] }
  0x1a   :  { %v1525_v51 = vor.u32 %v1882_v48, %v1524_v46  ;;  %v1880_v52 = vld [vmem:[#allocation3 + $0x1a4] sm:$0xf]  ;;  %v1526_v53 = vld [vmem:[#allocation3 + $0x1b0] sm:$0xf0]  ;;  %v1380_v54 = vld [vmem:[#allocation3 + $0x80] sm:$0xf]  ;;  %v1401_v55 = vor.u32 %v1848_v49, %v1398_v50 }
  0x1b   :  { %554 = vmatpush.bf16.msrb.mxu0 %v1413_v34  ;;  %568 = vmatpush.bf16.msrb.mxu1 %v1541_v38  ;;  %v1846_v56 = vld [vmem:[#allocation3 + $0x8c] sm:$0xf0]  ;;  %v1508_v57 = vld [vmem:[#allocation3 + $0x180] sm:$0xf]  ;;  %v1529_v59 = vor.u32 %v1880_v52, %v1526_v53  ;;  %v1844_v60 = vld [vmem:[#allocation3 + $0x84] sm:$0xf] }
  0x1c   :  { %582 = vmatpush.bf16.msrb.mxu2 %v1417_v42  ;;  %v1878_v58 = vld [vmem:[#allocation3 + $0x18c] sm:$0xf0]  ;;  %v1382_v61 = vld [vmem:[#allocation3 + $0x90] sm:$0xf0]  ;;  %v1381_v62 = vor.u32 %v1846_v56, %v1380_v54  ;;  %v1876_v63 = vld [vmem:[#allocation3 + $0x184] sm:$0xf] }
  0x1d   :  { %596 = vmatpush.bf16.msrb.mxu3 %v1545_v43  ;;  %v1510_v0 = vld [vmem:[#allocation3 + $0x190] sm:$0xf0]  ;;  %v1509_v1 = vor.u32 %v1878_v58, %v1508_v57  ;;  %v1364_v2 = vld [vmem:[#allocation3 + $0x60] sm:$0xf]  ;;  %v1842_v3 = vld [vmem:[#allocation3 + $0x6c] sm:$0xf0]  ;;  %v1385_v4 = vor.u32 %v1844_v60, %v1382_v61 }
  0x1e   :  { %v1492_v5 = vld [vmem:[#allocation3 + $0x160] sm:$0xf]  ;;  %v1874_v6 = vld [vmem:[#allocation3 + $0x16c] sm:$0xf0]  ;;  %v1513_v7 = vor.u32 %v1876_v63, %v1510_v0  ;;  %v1840_v8 = vld [vmem:[#allocation3 + $0x64] sm:$0xf]  ;;  %v1365_v10 = vor.u32 %v1842_v3, %v1364_v2 }
  0x1f   :  { %555 = vmatpush.bf16.msrb.mxu0 %v1397_v47  ;;  %569 = vmatpush.bf16.msrb.mxu1 %v1525_v51  ;;  %v1366_v9 = vld [vmem:[#allocation3 + $0x70] sm:$0xf0]  ;;  %v1872_v11 = vld [vmem:[#allocation3 + $0x164] sm:$0xf]  ;;  %v1493_v13 = vor.u32 %v1874_v6, %v1492_v5  ;;  %v1348_v14 = vld [vmem:[#allocation3 + $0x40] sm:$0xf] }
  0x20   :  { %583 = vmatpush.bf16.msrb.mxu2 %v1401_v55  ;;  %v1494_v12 = vld [vmem:[#allocation3 + $0x170] sm:$0xf0]  ;;  %v1838_v15 = vld [vmem:[#allocation3 + $0x4c] sm:$0xf0]  ;;  %v1369_v16 = vor.u32 %v1840_v8, %v1366_v9  ;;  %v1476_v17 = vld [vmem:[#allocation3 + $0x140] sm:$0xf] }
  0x21   :  { %597 = vmatpush.bf16.msrb.mxu3 %v1529_v59  ;;  %v1870_v18 = vld [vmem:[#allocation3 + $0x14c] sm:$0xf0]  ;;  %v1497_v19 = vor.u32 %v1872_v11, %v1494_v12  ;;  %v1836_v20 = vld [vmem:[#allocation3 + $0x44] sm:$0xf]  ;;  %v1350_v21 = vld [vmem:[#allocation3 + $0x50] sm:$0xf0]  ;;  %v1349_v22 = vor.u32 %v1838_v15, %v1348_v14 }
  0x22   :  { %v1868_v23 = vld [vmem:[#allocation3 + $0x144] sm:$0xf]  ;;  %v1478_v24 = vld [vmem:[#allocation3 + $0x150] sm:$0xf0]  ;;  %v1477_v25 = vor.u32 %v1870_v18, %v1476_v17  ;;  %v1332_v26 = vld [vmem:[#allocation3 + $0x20] sm:$0xf]  ;;  %v1353_v28 = vor.u32 %v1836_v20, %v1350_v21 }
  0x23   :  { %556 = vmatpush.bf16.msrb.mxu0 %v1381_v62  ;;  %570 = vmatpush.bf16.msrb.mxu1 %v1509_v1  ;;  %v1834_v27 = vld [vmem:[#allocation3 + $0x2c] sm:$0xf0]  ;;  %v1460_v29 = vld [vmem:[#allocation3 + $0x120] sm:$0xf]  ;;  %v1832_v31 = vld [vmem:[#allocation3 + $0x24] sm:$0xf]  ;;  %v1481_v32 = vor.u32 %v1868_v23, %v1478_v24 }
  0x24   :  { %584 = vmatpush.bf16.msrb.mxu2 %v1385_v4  ;;  %v1866_v30 = vld [vmem:[#allocation3 + $0x12c] sm:$0xf0]  ;;  %v1334_v33 = vld [vmem:[#allocation3 + $0x30] sm:$0xf0]  ;;  %v1864_v34 = vld [vmem:[#allocation3 + $0x124] sm:$0xf]  ;;  %v1333_v36 = vor.u32 %v1834_v27, %v1332_v26 }
  0x25   :  { %598 = vmatpush.bf16.msrb.mxu3 %v1513_v7  ;;  %v1462_v35 = vld [vmem:[#allocation3 + $0x130] sm:$0xf0]  ;;  %v1316_v37 = vld [vmem:[#allocation3] sm:$0xf]  ;;  %v1830_v38 = vld [vmem:[#allocation3 + $0xc] sm:$0xf0]  ;;  %v1461_v40 = vor.u32 %v1866_v30, %v1460_v29  ;;  %v1337_v44 = vor.u32 %v1832_v31, %v1334_v33 }
  0x26   :  { %v1444_v39 = vld [vmem:[#allocation3 + $0x100] sm:$0xf]  ;;  %v1862_v41 = vld [vmem:[#allocation3 + $0x10c] sm:$0xf0]  ;;  %v1828_v42 = vld [vmem:[#allocation3 + $0x4] sm:$0xf]  ;;  %v1465_v48 = vor.u32 %v1864_v34, %v1462_v35  ;;  %v1317_v52 = vor.u32 %v1830_v38, %v1316_v37 }
  0x27   :  { %557 = vmatpush.bf16.msrb.mxu0 %v1365_v10  ;;  %571 = vmatpush.bf16.msrb.mxu1 %v1493_v13  ;;  %v1318_v43 = vld [vmem:[#allocation3 + $0x10] sm:$0xf0]  ;;  %v1860_v45 = vld [vmem:[#allocation3 + $0x104] sm:$0xf]  ;;  %v1436_v46 = vld [vmem:[#allocation3 + $0xe8] sm:$0xf]  ;;  %v1445_v56 = vor.u32 %v1862_v41, %v1444_v39 }
  0x28   :  { %585 = vmatpush.bf16.msrb.mxu2 %v1369_v16  ;;  %v1859_v47 = vld [vmem:[#allocation3 + $0xf4] sm:$0xf0]  ;;  %v1446_v49 = vld [vmem:[#allocation3 + $0x110] sm:$0xf0]  ;;  %v1564_v50 = vld [vmem:[#allocation3 + $0x1e8] sm:$0xf]  ;;  %v1321_v61 = vor.u32 %v1828_v42, %v1318_v43 }
  0x29   :  { %599 = vmatpush.bf16.msrb.mxu3 %v1497_v19  ;;  %v1891_v51 = vld [vmem:[#allocation3 + $0x1f4] sm:$0xf0]  ;;  %v1857_v53 = vld [vmem:[#allocation3 + $0xec] sm:$0xf]  ;;  %v1438_v54 = vld [vmem:[#allocation3 + $0xf8] sm:$0xf0]  ;;  %v1437_v57 = vor.u32 %v1859_v47, %v1436_v46  ;;  %v1449_v1 = vor.u32 %v1860_v45, %v1446_v49 }
  0x2a   :  { %v1889_v55 = vld [vmem:[#allocation3 + $0x1ec] sm:$0xf]  ;;  %v1566_v58 = vld [vmem:[#allocation3 + $0x1f8] sm:$0xf0]  ;;  %v1565_v62 = vor.u32 %v1891_v51, %v1564_v50  ;;  %v1441_v2 = vor.u32 %v1857_v53, %v1438_v54  ;;  %v1420_v3 = vld [vmem:[#allocation3 + $0xc8] sm:$0xf] }
  0x2b   :  { %558 = vmatpush.bf16.msrb.mxu0 %v1349_v22  ;;  %572 = vmatpush.bf16.msrb.mxu1 %v1477_v25  ;;  %v67_v59 = vld [vmem:[%s2202_s1] sm:$0xff]  ;;  %v69_v60 = vld [vmem:[%s2202_s1 + $0x10] sm:$0xff]  ;;  %v68_v63 = vld [vmem:[%s2202_s1 + $0x8] sm:$0xff]  ;;  %v1569_v6 = vor.u32 %v1889_v55, %v1566_v58 }
  0x2c   :  { %586 = vmatpush.bf16.msrb.mxu2 %v1353_v28  ;;  %v70_v0 = vld [vmem:[%s2202_s1 + $0x18] sm:$0xff]  ;;  %v1548_v5 = vld [vmem:[#allocation3 + $0x1c8] sm:$0xf]  ;;  %v2142_v7 = vpack.c.bf16 %v69_v60, %v67_v59  ;;  %v1853_v9 = vld [vmem:[#allocation3 + $0xcc] sm:$0xf] }
  0x2d   :  { %600 = vmatpush.bf16.msrb.mxu3 %v1481_v32  ;;  %v1855_v4 = vld [vmem:[#allocation3 + $0xd4] sm:$0xf0]  ;;  %v1422_v10 = vld [vmem:[#allocation3 + $0xd8] sm:$0xf0]  ;;  %v2144_v11 = vpack.c.bf16 %v70_v0, %v68_v63  ;;  %v1885_v12 = vld [vmem:[#allocation3 + $0x1cc] sm:$0xf] }
  0x2e   :  { %v1887_v8 = vld [vmem:[#allocation3 + $0x1d4] sm:$0xf0]  ;;  %v1550_v13 = vld [vmem:[#allocation3 + $0x1d8] sm:$0xf0]  ;;  %v1421_v14 = vor.u32 %v1855_v4, %v1420_v3  ;;  %v1425_v16 = vor.u32 %v1853_v9, %v1422_v10  ;;  %v1404_v17 = vld [vmem:[#allocation3 + $0xa8] sm:$0xf] }
  0x2f   :  { %559 = vmatpush.bf16.msrb.mxu0 %v1333_v36  ;;  %573 = vmatpush.bf16.msrb.mxu1 %v1461_v40  ;;  %v1549_v15 = vor.u32 %v1887_v8, %v1548_v5  ;;  %v1851_v18 = vld [vmem:[#allocation3 + $0xb4] sm:$0xf0]  ;;  %v1532_v19 = vld [vmem:[#allocation3 + $0x1a8] sm:$0xf]  ;;  %v1553_v20 = vor.u32 %v1885_v12, %v1550_v13  ;;  %v1849_v22 = vld [vmem:[#allocation3 + $0xac] sm:$0xf] }
  0x30   :  { %587 = vmatpush.bf16.msrb.mxu2 %v1337_v44  ;;  %v1883_v21 = vld [vmem:[#allocation3 + $0x1b4] sm:$0xf0]  ;;  %v1406_v23 = vld [vmem:[#allocation3 + $0xb8] sm:$0xf0]  ;;  %v1881_v24 = vld [vmem:[#allocation3 + $0x1ac] sm:$0xf]  ;;  %v1405_v26 = vor.u32 %v1851_v18, %v1404_v17 }
  0x31   :  { %601 = vmatpush.bf16.msrb.mxu3 %v1465_v48  ;;  %v1534_v25 = vld [vmem:[#allocation3 + $0x1b8] sm:$0xf0]  ;;  %v1533_v27 = vor.u32 %v1883_v21, %v1532_v19  ;;  %v1409_v28 = vor.u32 %v1849_v22, %v1406_v23  ;;  %v1388_v29 = vld [vmem:[#allocation3 + $0x88] sm:$0xf]  ;;  %v1847_v30 = vld [vmem:[#allocation3 + $0x94] sm:$0xf0] }
  0x32   :  { %v1516_v31 = vld [vmem:[#allocation3 + $0x188] sm:$0xf]  ;;  %v1537_v32 = vor.u32 %v1881_v24, %v1534_v25  ;;  %v1879_v33 = vld [vmem:[#allocation3 + $0x194] sm:$0xf0]  ;;  %v1845_v34 = vld [vmem:[#allocation3 + $0x8c] sm:$0xf]  ;;  %v1389_v38 = vor.u32 %v1847_v30, %v1388_v29 }
  0x33   :  { %560 = vmatpush.bf16.msrb.mxu0 %v1317_v52  ;;  %574 = vmatpush.bf16.msrb.mxu1 %v1445_v56  ;;  %v1390_v35 = vld [vmem:[#allocation3 + $0x98] sm:$0xf0]  ;;  %v1877_v36 = vld [vmem:[#allocation3 + $0x18c] sm:$0xf]  ;;  %v1517_v39 = vor.u32 %v1879_v33, %v1516_v31  ;;  %v1372_v41 = vld [vmem:[#allocation3 + $0x68] sm:$0xf] }
  0x34   :  { %588 = vmatpush.bf16.msrb.mxu2 %v1321_v61  ;;  %v1518_v37 = vld [vmem:[#allocation3 + $0x198] sm:$0xf0]  ;;  %v1393_v40 = vor.u32 %v1845_v34, %v1390_v35  ;;  %v1843_v42 = vld [vmem:[#allocation3 + $0x74] sm:$0xf0]  ;;  %v1500_v43 = vld [vmem:[#allocation3 + $0x168] sm:$0xf] }
  0x35   :  { %602 = vmatpush.bf16.msrb.mxu3 %v1449_v1  ;;  %v1521_v44 = vor.u32 %v1877_v36, %v1518_v37  ;;  %v1875_v45 = vld [vmem:[#allocation3 + $0x174] sm:$0xf0]  ;;  %v1841_v46 = vld [vmem:[#allocation3 + $0x6c] sm:$0xf]  ;;  %v1374_v47 = vld [vmem:[#allocation3 + $0x78] sm:$0xf0]  ;;  %v1373_v50 = vor.u32 %v1843_v42, %v1372_v41 }
  0x36   :  { %561 = vmatmul.bf16.vlgmr.msrb.gmra.mxu0 %v2142_v7  ;;  %575 = vmatmul.bf16.vlgmr.msrb.gmra.mxu1 %v2144_v11  ;;  %v1873_v48 = vld [vmem:[#allocation3 + $0x16c] sm:$0xf]  ;;  %v1502_v49 = vld [vmem:[#allocation3 + $0x178] sm:$0xf0]  ;;  %v1356_v51 = vld [vmem:[#allocation3 + $0x48] sm:$0xf]  ;;  %v1501_v52 = vor.u32 %v1875_v45, %v1500_v43  ;;  %v1377_v53 = vor.u32 %v1841_v46, %v1374_v47 }
  0x37   :  { %609 = vmatpush.bf16.msra.mxu0 %v1437_v57  ;;  %623 = vmatpush.bf16.msra.mxu1 %v1565_v62  ;;  %v1839_v54 = vld [vmem:[#allocation3 + $0x54] sm:$0xf0]  ;;  %v1484_v55 = vld [vmem:[#allocation3 + $0x148] sm:$0xf]  ;;  %v1505_v56 = vor.u32 %v1873_v48, %v1502_v49  ;;  %v1837_v58 = vld [vmem:[#allocation3 + $0x4c] sm:$0xf] }
  0x38   :  { %637 = vmatpush.bf16.msra.mxu2 %v1441_v2  ;;  %603 = vmatmul.bf16.vlgmr.msrb.gmra.mxu3 %v2144_v11  ;;  %v1871_v57 = vld [vmem:[#allocation3 + $0x154] sm:$0xf0]  ;;  %v1358_v59 = vld [vmem:[#allocation3 + $0x58] sm:$0xf0]  ;;  %v1869_v60 = vld [vmem:[#allocation3 + $0x14c] sm:$0xf]  ;;  %v1357_v62 = vor.u32 %v1839_v54, %v1356_v51 }
  0x39   :  { %651 = vmatpush.bf16.msra.mxu3 %v1569_v6  ;;  %589 = vmatmul.bf16.vlgmr.msrb.gmra.mxu2 %v2142_v7  ;;  %v1486_v61 = vld [vmem:[#allocation3 + $0x158] sm:$0xf0]  ;;  %v1485_v63 = vor.u32 %v1871_v57, %v1484_v55  ;;  %v1361_v0 = vor.u32 %v1837_v58, %v1358_v59  ;;  %v1340_v1 = vld [vmem:[#allocation3 + $0x28] sm:$0xf]  ;;  %v1835_v2 = vld [vmem:[#allocation3 + $0x34] sm:$0xf0] }
  0x3a   :  { %v1468_v3 = vld [vmem:[#allocation3 + $0x128] sm:$0xf]  ;;  %v1489_v4 = vor.u32 %v1869_v60, %v1486_v61  ;;  %v1867_v5 = vld [vmem:[#allocation3 + $0x134] sm:$0xf0]  ;;  %v1833_v6 = vld [vmem:[#allocation3 + $0x2c] sm:$0xf]  ;;  %v1341_v12 = vor.u32 %v1835_v2, %v1340_v1 }
  0x3b   :  { %610 = vmatpush.bf16.msra.mxu0 %v1421_v14  ;;  %624 = vmatpush.bf16.msra.mxu1 %v1549_v15  ;;  %v1342_v8 = vld [vmem:[#allocation3 + $0x38] sm:$0xf0]  ;;  %v1865_v9 = vld [vmem:[#allocation3 + $0x12c] sm:$0xf]  ;;  %v1324_v13 = vld [vmem:[#allocation3 + $0x8] sm:$0xf]  ;;  %v1469_v14 = vor.u32 %v1867_v5, %v1468_v3 }
  0x3c   :  { %638 = vmatpush.bf16.msra.mxu2 %v1425_v16  ;;  %v1470_v10 = vld [vmem:[#allocation3 + $0x138] sm:$0xf0]  ;;  %v1345_v15 = vor.u32 %v1833_v6, %v1342_v8  ;;  %v1831_v16 = vld [vmem:[#allocation3 + $0x14] sm:$0xf0]  ;;  %v1452_v17 = vld [vmem:[#allocation3 + $0x108] sm:$0xf] }
  0x3d   :  { %652 = vmatpush.bf16.msra.mxu3 %v1553_v20  ;;  %v1863_v18 = vld [vmem:[#allocation3 + $0x114] sm:$0xf0]  ;;  %v1473_v19 = vor.u32 %v1865_v9, %v1470_v10  ;;  %v1829_v20 = vld [vmem:[#allocation3 + $0xc] sm:$0xf]  ;;  %v1326_v21 = vld [vmem:[#allocation3 + $0x18] sm:$0xf0] }
  0x3e   :  { %v1861_v22 = vld [vmem:[#allocation3 + $0x10c] sm:$0xf]  ;;  %v1454_v23 = vld [vmem:[#allocation3 + $0x118] sm:$0xf0]  ;;  %v1628_v24 = vld [vmem:[#allocation5 + $0x70] sm:$0xf]  ;;  %v1453_v29 = vor.u32 %v1863_v18, %v1452_v17  ;;  %v1329_v30 = vor.u32 %v1829_v20, %v1326_v21 }
  0x3f   :  { %611 = vmatpush.bf16.msra.mxu0 %v1405_v26  ;;  %625 = vmatpush.bf16.msra.mxu1 %v1533_v27  ;;  %v1911_v25 = vld [vmem:[#allocation5 + $0x74] sm:$0xf0]  ;;  %v1325_v26 = vor.u32 %v1831_v16, %v1324_v13  ;;  %v1692_v27 = vld [vmem:[#allocation5 + $0xf0] sm:$0xf]  ;;  %v1457_v31 = vor.u32 %v1861_v22, %v1454_v23  ;;  %v1620_v33 = vld [vmem:[#allocation5 + $0x60] sm:$0xf] }
  0x40   :  { %639 = vmatpush.bf16.msra.mxu2 %v1409_v28  ;;  %v1927_v28 = vld [vmem:[#allocation5 + $0xf4] sm:$0xf0]  ;;  %v1909_v34 = vld [vmem:[#allocation5 + $0x64] sm:$0xf0]  ;;  %v1612_v37 = vld [vmem:[#allocation5 + $0x50] sm:$0xf] }
  0x41   :  { %653 = vmatpush.bf16.msra.mxu3 %v1537_v32  ;;  %v1629_v32 = vor.u32 %v1911_v25, %v1628_v24  ;;  %v1693_v35 = vor.u32 %v1927_v28, %v1692_v27  ;;  %v1621_v36 = vor.u32 %v1909_v34, %v1620_v33  ;;  %v1925_v41 = vld [vmem:[#allocation5 + $0xe4] sm:$0xf0]  ;;  %v1604_v42 = vld [vmem:[#allocation5 + $0x40] sm:$0xf]  ;;  %v1676_v46 = vld [vmem:[#allocation5 + $0xd0] sm:$0xf] }
  0x42   :  { %v1923_v47 = vld [vmem:[#allocation5 + $0xd4] sm:$0xf0]  ;;  %v1596_v49 = vld [vmem:[#allocation5 + $0x30] sm:$0xf]  ;;  %v1921_v51 = vld [vmem:[#allocation5 + $0xc4] sm:$0xf0] }
  0x43   :  { %612 = vmatpush.bf16.msra.mxu0 %v1389_v38  ;;  %626 = vmatpush.bf16.msra.mxu1 %v1517_v39  ;;  %v1907_v38 = vld [vmem:[#allocation5 + $0x54] sm:$0xf0]  ;;  %v1677_v48 = vor.u32 %v1923_v47, %v1676_v46  ;;  %v1901_v54 = vld [vmem:[#allocation5 + $0x24] sm:$0xf0]  ;;  %v1580_v59 = vld [vmem:[#allocation5 + $0x10] sm:$0xf] }
  0x44   :  { %640 = vmatpush.bf16.msra.mxu2 %v1393_v40  ;;  %v1613_v39 = vor.u32 %v1907_v38, %v1612_v37  ;;  %v1684_v40 = vld [vmem:[#allocation5 + $0xe0] sm:$0xf]  ;;  %v1919_v57 = vld [vmem:[#allocation5 + $0xb4] sm:$0xf0]  ;;  %v1897_v2 = vld [vmem:[#allocation5 + $0x4] sm:$0xf0] }
  0x45   :  { %654 = vmatpush.bf16.msra.mxu3 %v1521_v44  ;;  %v1685_v43 = vor.u32 %v1925_v41, %v1684_v40  ;;  %v1905_v44 = vld [vmem:[#allocation5 + $0x44] sm:$0xf0]  ;;  %v1899_v60 = vld [vmem:[#allocation5 + $0x14] sm:$0xf0]  ;;  %v1572_v1 = vld [vmem:[#allocation5] sm:$0xf] }
  0x46   :  { %v1605_v45 = vor.u32 %v1905_v44, %v1604_v42  ;;  %v1581_v61 = vor.u32 %v1899_v60, %v1580_v59  ;;  %v1573_v3 = vor.u32 %v1897_v2, %v1572_v1  ;;  %v1943_v5 = vld [vmem:[#allocation5 + $0x174] sm:$0xf0]  ;;  %v1910_v8 = vld [vmem:[#allocation5 + $0x74] sm:$0xf]  ;;  %v1630_v9 = vld [vmem:[#allocation5 + $0x78] sm:$0xf0] }
  0x47   :  { %613 = vmatpush.bf16.msra.mxu0 %v1373_v50  ;;  %627 = vmatpush.bf16.msra.mxu1 %v1501_v52  ;;  %v1668_v50 = vld [vmem:[#allocation5 + $0xc0] sm:$0xf]  ;;  %v1644_v10 = vld [vmem:[#allocation5 + $0x90] sm:$0xf]  ;;  %v1915_v13 = vld [vmem:[#allocation5 + $0x94] sm:$0xf0] }
  0x48   :  { %641 = vmatpush.bf16.msra.mxu2 %v1377_v53  ;;  %v1588_v52 = vld [vmem:[#allocation5 + $0x20] sm:$0xf]  ;;  %v1669_v53 = vor.u32 %v1921_v51, %v1668_v50  ;;  %v1941_v16 = vld [vmem:[#allocation5 + $0x164] sm:$0xf0]  ;;  %v1908_v17 = vld [vmem:[#allocation5 + $0x64] sm:$0xf] }
  0x49   :  { %655 = vmatpush.bf16.msra.mxu3 %v1505_v56  ;;  %v1589_v55 = vor.u32 %v1901_v54, %v1588_v52  ;;  %v1660_v56 = vld [vmem:[#allocation5 + $0xb0] sm:$0xf]  ;;  %v1636_v20 = vld [vmem:[#allocation5 + $0x80] sm:$0xf]  ;;  %v1913_v21 = vld [vmem:[#allocation5 + $0x84] sm:$0xf0] }
  0x4a   :  { %v1661_v58 = vor.u32 %v1919_v57, %v1660_v56  ;;  %v1637_v23 = vor.u32 %v1913_v21, %v1636_v20  ;;  %v1820_v24 = vld [vmem:[#allocation5 + $0x1f0] sm:$0xf]  ;;  %v1959_v25 = vld [vmem:[#allocation5 + $0x1f4] sm:$0xf0]  ;;  %v1926_v27 = vld [vmem:[#allocation5 + $0xf4] sm:$0xf] }
  0x4b   :  { %614 = vmatpush.bf16.msra.mxu0 %v1357_v62  ;;  %628 = vmatpush.bf16.msra.mxu1 %v1485_v63  ;;  %v1652_v62 = vld [vmem:[#allocation5 + $0xa0] sm:$0xf]  ;;  %v1917_v63 = vld [vmem:[#allocation5 + $0xa4] sm:$0xf0]  ;;  %v1694_v28 = vld [vmem:[#allocation5 + $0xf8] sm:$0xf0] }
  0x4c   :  { %642 = vmatpush.bf16.msra.mxu2 %v1361_v0  ;;  %v1653_v0 = vor.u32 %v1917_v63, %v1652_v62  ;;  %v1906_v33 = vld [vmem:[#allocation5 + $0x54] sm:$0xf]  ;;  %v1812_v38 = vld [vmem:[#allocation5 + $0x1e0] sm:$0xf]  ;;  %v1924_v40 = vld [vmem:[#allocation5 + $0xe4] sm:$0xf] }
  0x4d   :  { %656 = vmatpush.bf16.msra.mxu3 %v1489_v4  ;;  %v1756_v4 = vld [vmem:[#allocation5 + $0x170] sm:$0xf]  ;;  %v1686_v42 = vld [vmem:[#allocation5 + $0xe8] sm:$0xf0]  ;;  %v1732_v44 = vld [vmem:[#allocation5 + $0x140] sm:$0xf] }
  0x4e   :  { %v1757_v6 = vor.u32 %v1943_v5, %v1756_v4  ;;  %v1904_v46 = vld [vmem:[#allocation5 + $0x44] sm:$0xf]  ;;  %v1922_v50 = vld [vmem:[#allocation5 + $0xd4] sm:$0xf]  ;;  %v1724_v56 = vld [vmem:[#allocation5 + $0x130] sm:$0xf] }
  0x4f   :  { %615 = vmatpush.bf16.msra.mxu0 %v1341_v12  ;;  %629 = vmatpush.bf16.msra.mxu1 %v1469_v14  ;;  %v1633_v12 = vor.u32 %v1910_v8, %v1630_v9  ;;  %v1645_v14 = vor.u32 %v1915_v13, %v1644_v10  ;;  %v1935_v57 = vld [vmem:[#allocation5 + $0x134] sm:$0xf0]  ;;  %v1598_v60 = vld [vmem:[#allocation5 + $0x38] sm:$0xf0]  ;;  %v1796_v63 = vld [vmem:[#allocation5 + $0x1c0] sm:$0xf] }
  0x50   :  { %643 = vmatpush.bf16.msra.mxu2 %v1345_v15  ;;  %v1748_v15 = vld [vmem:[#allocation5 + $0x160] sm:$0xf]  ;;  %v1725_v59 = vor.u32 %v1935_v57, %v1724_v56  ;;  %v1920_v1 = vld [vmem:[#allocation5 + $0xc4] sm:$0xf]  ;;  %v1670_v4 = vld [vmem:[#allocation5 + $0xc8] sm:$0xf0] }
  0x51   :  { %657 = vmatpush.bf16.msra.mxu3 %v1473_v19  ;;  %v1749_v18 = vor.u32 %v1941_v16, %v1748_v15  ;;  %v1622_v19 = vld [vmem:[#allocation5 + $0x68] sm:$0xf0]  ;;  %v1673_v5 = vor.u32 %v1920_v1, %v1670_v4  ;;  %v1933_v8 = vld [vmem:[#allocation5 + $0x124] sm:$0xf0]  ;;  %v1900_v9 = vld [vmem:[#allocation5 + $0x24] sm:$0xf] }
  0x52   :  { %v1625_v22 = vor.u32 %v1908_v17, %v1622_v19  ;;  %v1951_v15 = vld [vmem:[#allocation5 + $0x1b4] sm:$0xf0]  ;;  %v1918_v16 = vld [vmem:[#allocation5 + $0xb4] sm:$0xf]  ;;  %v1708_v20 = vld [vmem:[#allocation5 + $0x110] sm:$0xf] }
  0x53   :  { %616 = vmatpush.bf16.msra.mxu0 %v1325_v26  ;;  %630 = vmatpush.bf16.msra.mxu1 %v1453_v29  ;;  %v1821_v26 = vor.u32 %v1959_v25, %v1820_v24  ;;  %v1931_v21 = vld [vmem:[#allocation5 + $0x114] sm:$0xf0]  ;;  %v1582_v25 = vld [vmem:[#allocation5 + $0x18] sm:$0xf0]  ;;  %v1940_v56 = vld [vmem:[#allocation5 + $0x164] sm:$0xf] }
  0x54   :  { %644 = vmatpush.bf16.msra.mxu2 %v1329_v30  ;;  %v1697_v30 = vor.u32 %v1926_v27, %v1694_v28  ;;  %v1709_v24 = vor.u32 %v1931_v21, %v1708_v20  ;;  %v1780_v28 = vld [vmem:[#allocation5 + $0x1a0] sm:$0xf]  ;;  %v1750_v57 = vld [vmem:[#allocation5 + $0x168] sm:$0xf0] }
  0x55   :  { %658 = vmatpush.bf16.msra.mxu3 %v1457_v31  ;;  %v1740_v31 = vld [vmem:[#allocation5 + $0x150] sm:$0xf]  ;;  %v1638_v1 = vld [vmem:[#allocation5 + $0x88] sm:$0xf0] }
  0x56   :  { %617 = vmatmul.bf16.vlgmr.msra.gmra.mxu0 %v2142_v7  ;;  %631 = vmatmul.bf16.vlgmr.msra.gmra.mxu1 %v2144_v11 }
  0x57   :  { %1101 = vmatpush.bf16.msrb.mxu0 %v1629_v32  ;;  %1115 = vmatpush.bf16.msrb.mxu1 %v1693_v35  ;;  %v1939_v32 = vld [vmem:[#allocation5 + $0x154] sm:$0xf0] }
  0x58   :  { %645 = vmatmul.bf16.vlgmr.msra.gmra.mxu2 %v2142_v7  ;;  %659 = vmatmul.bf16.vlgmr.msra.gmra.mxu3 %v2144_v11  ;;  %v1903_v7 = vld [vmem:[#allocation5 + $0x34] sm:$0xf0]  ;;  %v1741_v35 = vor.u32 %v1939_v32, %v1740_v31  ;;  %v1916_v31 = vld [vmem:[#allocation5 + $0xa4] sm:$0xf] }
  0x59   :  { %v1597_v11 = vor.u32 %v1903_v7, %v1596_v49  ;;  %1129 = vmatpush.bf16.msrb.mxu2 %v1757_v6  ;;  %1143 = vmatpush.bf16.msrb.mxu3 %v1821_v26  ;;  %v1804_v7 = vld [vmem:[#allocation5 + $0x1d0] sm:$0xf]  ;;  %v1716_v6 = vld [vmem:[#allocation5 + $0x120] sm:$0xf] }
  0x5a   :  { %v1717_v10 = vor.u32 %v1933_v8, %v1716_v6  ;;  %v1958_v8 = vld [vmem:[#allocation5 + $0x1f4] sm:$0xf] }
  0x5b   :  { %1102 = vmatpush.bf16.msrb.mxu0 %v1621_v36  ;;  %1116 = vmatpush.bf16.msrb.mxu1 %v1685_v43  ;;  %v1614_v36 = vld [vmem:[#allocation5 + $0x58] sm:$0xf0]  ;;  %v1689_v43 = vor.u32 %v1924_v40, %v1686_v42 }
  0x5c   :  { %v1617_v37 = vor.u32 %v1906_v33, %v1614_v36  ;;  %v1654_v33 = vld [vmem:[#allocation5 + $0xa8] sm:$0xf0]  ;;  %v2173_v36 = vld [vmem:[%s2205_s4] sm:$0xf] }
  0x5d   :  { %1130 = vmatpush.bf16.msrb.mxu2 %v1749_v18  ;;  %v1662_v18 = vld [vmem:[#allocation5 + $0xb8] sm:$0xf0]  ;;  %v668_v21 = vperm.slane %v2173_v36, 1 }
  0x5e   :  { %v1665_v19 = vor.u32 %v1918_v16, %v1662_v18  ;;  %v1742_v16 = vld [vmem:[#allocation5 + $0x158] sm:$0xf0] }
  0x5f   :  { %1103 = vmatpush.bf16.msrb.mxu0 %v1613_v39  ;;  %1117 = vmatpush.bf16.msrb.mxu1 %v1677_v48  ;;  %v1957_v39 = vld [vmem:[#allocation5 + $0x1e4] sm:$0xf0]  ;;  %v1606_v48 = vld [vmem:[#allocation5 + $0x48] sm:$0xf0] }
  0x60   :  { %v1813_v41 = vor.u32 %v1957_v39, %v1812_v38  ;;  %v1609_v49 = vor.u32 %v1904_v46, %v1606_v48  ;;  %v1700_v38 = vld [vmem:[#allocation5 + $0x100] sm:$0xf]  ;;  %v1929_v39 = vld [vmem:[#allocation5 + $0x104] sm:$0xf0]  ;;  %v1772_v48 = vld [vmem:[#allocation5 + $0x190] sm:$0xf] }
  0x61   :  { %1131 = vmatpush.bf16.msrb.mxu2 %v1741_v35  ;;  %v1701_v42 = vor.u32 %v1929_v39, %v1700_v38  ;;  %v1806_v38 = vld [vmem:[#allocation5 + $0x1d8] sm:$0xf0] }
  0x62   :  { %1144 = vmatpush.bf16.msrb.mxu3 %v1813_v41 }
  0x63   :  { %1104 = vmatpush.bf16.msrb.mxu0 %v1605_v45  ;;  %1118 = vmatpush.bf16.msrb.mxu1 %v1669_v53  ;;  %v1937_v45 = vld [vmem:[#allocation5 + $0x144] sm:$0xf0]  ;;  %v1678_v53 = vld [vmem:[#allocation5 + $0xd8] sm:$0xf0] }
  0x64   :  { %v1733_v47 = vor.u32 %v1937_v45, %v1732_v44  ;;  %v1574_v44 = vld [vmem:[#allocation5 + $0x8] sm:$0xf0]  ;;  %v1942_v45 = vld [vmem:[#allocation5 + $0x174] sm:$0xf] }
  0x66   :  { %1132 = vmatpush.bf16.msrb.mxu2 %v1733_v47  ;;  %v1758_v47 = vld [vmem:[#allocation5 + $0x178] sm:$0xf0] }
  0x67   :  { %1105 = vmatpush.bf16.msrb.mxu0 %v1597_v11  ;;  %1119 = vmatpush.bf16.msrb.mxu1 %v1661_v58  ;;  %v1955_v11 = vld [vmem:[#allocation5 + $0x1d4] sm:$0xf0]  ;;  %v1902_v58 = vld [vmem:[#allocation5 + $0x34] sm:$0xf] }
  0x68   :  { %v1805_v52 = vor.u32 %v1955_v11, %v1804_v7  ;;  %v1601_v62 = vor.u32 %v1902_v58, %v1598_v60  ;;  %v1761_v7 = vor.u32 %v1942_v45, %v1758_v47  ;;  %v1753_v58 = vor.u32 %v1940_v56, %v1750_v57  ;;  %v1945_v60 = vld [vmem:[#allocation5 + $0x184] sm:$0xf0]  ;;  %v1952_v47 = vld [vmem:[#allocation5 + $0x1c4] sm:$0xf] }
  0x6a   :  { %1145 = vmatpush.bf16.msrb.mxu3 %v1805_v52  ;;  %1133 = vmatpush.bf16.msrb.mxu2 %v1725_v59  ;;  %v1646_v52 = vld [vmem:[#allocation5 + $0x98] sm:$0xf0]  ;;  %v1764_v59 = vld [vmem:[#allocation5 + $0x180] sm:$0xf] }
  0x6b   :  { %1106 = vmatpush.bf16.msrb.mxu0 %v1589_v55  ;;  %1120 = vmatpush.bf16.msrb.mxu1 %v1653_v0  ;;  %v1681_v55 = vor.u32 %v1922_v50, %v1678_v53  ;;  %v1953_v0 = vld [vmem:[#allocation5 + $0x1c4] sm:$0xf0]  ;;  %v1914_v50 = vld [vmem:[#allocation5 + $0x94] sm:$0xf] }
  0x6c   :  { %v1649_v53 = vor.u32 %v1914_v50, %v1646_v52  ;;  %v1718_v50 = vld [vmem:[#allocation5 + $0x128] sm:$0xf0] }
  0x6e   :  { %1134 = vmatpush.bf16.msrb.mxu2 %v1717_v10 }
  0x6f   :  { %1107 = vmatpush.bf16.msrb.mxu0 %v1581_v61  ;;  %1121 = vmatpush.bf16.msrb.mxu1 %v1645_v14  ;;  %v1788_v14 = vld [vmem:[#allocation5 + $0x1b0] sm:$0xf] }
  0x70   :  { %v1789_v17 = vor.u32 %v1951_v15, %v1788_v14  ;;  %v1938_v15 = vld [vmem:[#allocation5 + $0x154] sm:$0xf] }
  0x72   :  { %1135 = vmatpush.bf16.msrb.mxu2 %v1709_v24 }
  0x73   :  { %1108 = vmatpush.bf16.msrb.mxu0 %v1573_v3  ;;  %1122 = vmatpush.bf16.msrb.mxu1 %v1637_v23  ;;  %v1797_v3 = vor.u32 %v1953_v0, %v1796_v63  ;;  %v1765_v0 = vor.u32 %v1945_v60, %v1764_v59  ;;  %v1930_v59 = vld [vmem:[#allocation5 + $0x114] sm:$0xf]  ;;  %v1710_v60 = vld [vmem:[#allocation5 + $0x118] sm:$0xf0] }
  0x75   :  { %1146 = vmatpush.bf16.msrb.mxu3 %v1797_v3 }
  0x76   :  { %1136 = vmatpush.bf16.msrb.mxu2 %v1701_v42  ;;  %v1934_v42 = vld [vmem:[#allocation5 + $0x134] sm:$0xf] }
  0x77   :  { %1157 = vmatpush.bf16.msra.mxu0 %v1633_v12  ;;  %1171 = vmatpush.bf16.msra.mxu1 %v1697_v30  ;;  %v1590_v12 = vld [vmem:[#allocation5 + $0x28] sm:$0xf0]  ;;  %v1949_v30 = vld [vmem:[#allocation5 + $0x1a4] sm:$0xf0] }
  0x78   :  { %v1593_v13 = vor.u32 %v1900_v9, %v1590_v12  ;;  %v1781_v32 = vor.u32 %v1949_v30, %v1780_v28  ;;  %v1822_v9 = vld [vmem:[#allocation5 + $0x1f8] sm:$0xf0] }
  0x79   :  { %1147 = vmatpush.bf16.msrb.mxu3 %v1789_v17  ;;  %v1825_v14 = vor.u32 %v1958_v8, %v1822_v9  ;;  %v1745_v17 = vor.u32 %v1938_v15, %v1742_v16  ;;  %v1774_v8 = vld [vmem:[#allocation5 + $0x198] sm:$0xf0]  ;;  %v1944_v15 = vld [vmem:[#allocation5 + $0x184] sm:$0xf]  ;;  %v1766_v16 = vld [vmem:[#allocation5 + $0x188] sm:$0xf0] }
  0x7a   :  { %1185 = vmatpush.bf16.msra.mxu2 %v1761_v7 }
  0x7b   :  { %1158 = vmatpush.bf16.msra.mxu0 %v1625_v22  ;;  %1172 = vmatpush.bf16.msra.mxu1 %v1689_v43  ;;  %v1898_v22 = vld [vmem:[#allocation5 + $0x14] sm:$0xf]  ;;  %v1896_v43 = vld [vmem:[#allocation5 + $0x4] sm:$0xf] }
  0x7c   :  { %v1585_v27 = vor.u32 %v1898_v22, %v1582_v25  ;;  %v1577_v46 = vor.u32 %v1896_v43, %v1574_v44  ;;  %v1726_v43 = vld [vmem:[#allocation5 + $0x138] sm:$0xf0] }
  0x7d   :  { %1148 = vmatpush.bf16.msrb.mxu3 %v1781_v32  ;;  %v1954_v32 = vld [vmem:[#allocation5 + $0x1d4] sm:$0xf] }
  0x7e   :  { %1186 = vmatpush.bf16.msra.mxu2 %v1753_v58 }
  0x7f   :  { %1159 = vmatpush.bf16.msra.mxu0 %v1617_v37  ;;  %1173 = vmatpush.bf16.msra.mxu1 %v1681_v55  ;;  %v1657_v37 = vor.u32 %v1916_v31, %v1654_v33 }
  0x82   :  { %1187 = vmatpush.bf16.msra.mxu2 %v1745_v17 }
  0x83   :  { %1160 = vmatpush.bf16.msra.mxu0 %v1609_v49  ;;  %1174 = vmatpush.bf16.msra.mxu1 %v1673_v5  ;;  %v1947_v49 = vld [vmem:[#allocation5 + $0x194] sm:$0xf0] }
  0x84   :  { %v1773_v11 = vor.u32 %v1947_v49, %v1772_v48  ;;  %v1798_v48 = vld [vmem:[#allocation5 + $0x1c8] sm:$0xf0] }
  0x86   :  { %1149 = vmatpush.bf16.msrb.mxu3 %v1773_v11  ;;  %v1801_v11 = vor.u32 %v1952_v47, %v1798_v48 }
  0x87   :  { %1161 = vmatpush.bf16.msra.mxu0 %v1601_v62  ;;  %1175 = vmatpush.bf16.msra.mxu1 %v1665_v19  ;;  %v1912_v62 = vld [vmem:[#allocation5 + $0x84] sm:$0xf] }
  0x88   :  { %v1641_v6 = vor.u32 %v1912_v62, %v1638_v1  ;;  %v1956_v19 = vld [vmem:[#allocation5 + $0x1e4] sm:$0xf]  ;;  %v1782_v1 = vld [vmem:[#allocation5 + $0x1a8] sm:$0xf0] }
  0x89   :  { %v1948_v62 = vld [vmem:[#allocation5 + $0x1a4] sm:$0xf] }
  0x8a   :  { %1150 = vmatpush.bf16.msrb.mxu3 %v1765_v0  ;;  %v1713_v0 = vor.u32 %v1930_v59, %v1710_v60 }
  0x8b   :  { %1162 = vmatpush.bf16.msra.mxu0 %v1593_v13  ;;  %1176 = vmatpush.bf16.msra.mxu1 %v1657_v37 }
  0x8e   :  { %1199 = vmatpush.bf16.msra.mxu3 %v1825_v14 }
  0x8f   :  { %1163 = vmatpush.bf16.msra.mxu0 %v1585_v27  ;;  %1177 = vmatpush.bf16.msra.mxu1 %v1649_v53  ;;  %v1734_v27 = vld [vmem:[#allocation5 + $0x148] sm:$0xf0] }
  0x93   :  { %v2154_v29 = vpop.f32.mrf.mxu0  ;;  %v2156_v34 = vpop.f32.mrf.mxu1  ;;  %1164 = vmatpush.bf16.msra.mxu0 %v1577_v46  ;;  %1178 = vmatpush.bf16.msra.mxu1 %v1641_v6  ;;  %v1729_v46 = vor.u32 %v1934_v42, %v1726_v43  ;;  %v1946_v6 = vld [vmem:[#allocation5 + $0x194] sm:$0xf] }
  0x94   :  { %v1777_v14 = vor.u32 %v1946_v6, %v1774_v8  ;;  %v1225_v6 = vld [vmem:[%s2208_s7] sm:$0x3] }
  0x9b   :  { %v2160_v54 = vpop.f32.mrf.mxu3  ;;  %v2162_v61 = vpop.f32.mrf.mxu0 }
  0x9c   :  { %v2158_v51 = vpop.f32.mrf.mxu2  ;;  %v2164_v2 = vpop.f32.mrf.mxu1 }
  0xa3   :  { %v2168_v26 = vpop.f32.mrf.mxu3 }
  0xa4   :  { %v2166_v23 = vpop.f32.mrf.mxu2 }
  0xb3   :  { %v562_v35 = vpop.f32.mrf.mxu0  ;;  %v576_v41 = vpop.f32.mrf.mxu1 }
  0xb4   :  { %v563_v40 = vadd.f32 %v562_v35, %v2154_v29  ;;  %v667_v29 = vperm.slane %v2173_v36, 0 }
  0xb6   :  { %v577_v55 = vadd.f32 %v576_v41, %v563_v40  ;;  %v1809_v41 = vor.u32 %v1954_v32, %v1806_v38 }
  0xb8   :  { %v675_v10 = vadd.f32 %v667_v29, %v577_v55  ;;  %v1950_v55 = vld [vmem:[#allocation5 + $0x1b4] sm:$0xf] }
  0xba   :  { %v691_v24 = vmul.f32 0.2, %v675_v10  ;;  %vm683_vm2 = vcmp.gt.f32.partialorder %v675_v10, 0.0 }
  0xbb   :  { %v564_v4 = vpop.f32.mrf.mxu0  ;;  %v604_v5 = vpop.f32.mrf.mxu3 }
  0xbc   :  { %v590_v63 = vpop.f32.mrf.mxu2  ;;  %v565_v12 = vadd.f32 %v564_v4, %v2162_v61  ;;  %v578_v13 = vpop.f32.mrf.mxu1  ;;  %v1936_v61 = vld [vmem:[#allocation5 + $0x144] sm:$0xf]  ;;  %v699_v39 = vsel %vm683_vm2, %v675_v10, %v691_v24  ;;  %v1702_v4 = vld [vmem:[#allocation5 + $0x108] sm:$0xf0] }
  0xbd   :  { %v591_v3 = vadd.f32 %v590_v63, %v2156_v34  ;;  %v1814_v34 = vld [vmem:[#allocation5 + $0x1e8] sm:$0xf0]  ;;  %v1737_v28 = vor.u32 %v1936_v61, %v1734_v27 }
  0xbe   :  { %v579_v18 = vadd.f32 %v578_v13, %v565_v12  ;;  %v1817_v22 = vor.u32 %v1956_v19, %v1814_v34  ;;  %v1769_v19 = vor.u32 %v1944_v15, %v1766_v16  ;;  %v1228_v15 = vperm.slane %v1225_v6, 1 }
  0xbf   :  { %v605_v20 = vadd.f32 %v604_v5, %v591_v3  ;;  %1188 = vmatpush.bf16.msra.mxu2 %v1737_v28  ;;  %v1928_v3 = vld [vmem:[#allocation5 + $0x104] sm:$0xf]  ;;  %v1785_v5 = vor.u32 %v1948_v62, %v1782_v1  ;;  %v670_v28 = vperm.slane %v2173_v36, 3 }
  0xc0   :  { %v679_v25 = vadd.f32 %v667_v29, %v579_v18  ;;  %1200 = vmatpush.bf16.msra.mxu3 %v1817_v22  ;;  %v1790_v29 = vld [vmem:[#allocation5 + $0x1b8] sm:$0xf0]  ;;  %v1705_v10 = vor.u32 %v1928_v3, %v1702_v4  ;;  %v669_v18 = vperm.slane %v2173_v36, 2 }
  0xc1   :  { %v676_v33 = vadd.f32 %v668_v21, %v605_v20  ;;  %v1793_v58 = vor.u32 %v1950_v55, %v1790_v29 }
  0xc2   :  { %vm687_vm3 = vcmp.gt.f32.partialorder %v679_v25, 0.0  ;;  %v695_v30 = vmul.f32 0.2, %v679_v25 }
  0xc3   :  { %v606_v37 = vpop.f32.mrf.mxu3  ;;  %v692_v49 = vmul.f32 0.2, %v676_v33  ;;  %vm684_vm4 = vcmp.gt.f32.partialorder %v676_v33, 0.0  ;;  %1189 = vmatpush.bf16.msra.mxu2 %v1729_v46 }
  0xc4   :  { %v592_v31 = vpop.f32.mrf.mxu2  ;;  %v703_v40 = vsel %vm687_vm3, %v679_v25, %v695_v30  ;;  %1201 = vmatpush.bf16.msra.mxu3 %v1809_v41 }
  0xc5   :  { %v593_v35 = vadd.f32 %v592_v31, %v2164_v2  ;;  %v707_v45 = vpack.c.bf16 %v703_v40, %v699_v39  ;;  %v1932_v2 = vld [vmem:[#allocation5 + $0x124] sm:$0xf]  ;;  %v700_v56 = vsel %vm684_vm4, %v676_v33, %v692_v49  ;;  %v775_v49 = vld [vmem:[%s2207_s6] sm:$0x3] }
  0xc6   :  { %v1721_v53 = vor.u32 %v1932_v2, %v1718_v50  ;;  %v777_v2 = vperm.slane %v775_v49, 0  ;;  %v778_v29 = vperm.slane %v775_v49, 1 }
  0xc7   :  { %v607_v44 = vadd.f32 %v606_v37, %v593_v35  ;;  %1109 = vmatmul.bf16.vlgmr.msrb.gmra.mxu0 %v707_v45 }
  0xc8   :  { %1202 = vmatpush.bf16.msra.mxu3 %v1801_v11  ;;  %1190 = vmatpush.bf16.msra.mxu2 %v1721_v53 }
  0xc9   :  { %v680_v7 = vadd.f32 %v668_v21, %v607_v44 }
  0xcb   :  { %vm688_vm5 = vcmp.gt.f32.partialorder %v680_v7, 0.0  ;;  %v696_v52 = vmul.f32 0.2, %v680_v7 }
  0xcc   :  { %1203 = vmatpush.bf16.msra.mxu3 %v1793_v58  ;;  %1191 = vmatpush.bf16.msra.mxu2 %v1713_v0 }
  0xcd   :  { %v704_v57 = vsel %vm688_vm5, %v680_v7, %v696_v52 }
  0xce   :  { %v708_v63 = vpack.c.bf16 %v704_v57, %v700_v56 }
  0xd0   :  { %1123 = vmatmul.bf16.vlgmr.msrb.gmra.mxu1 %v708_v63  ;;  %1204 = vmatpush.bf16.msra.mxu3 %v1785_v5 }
  0xd1   :  { %1192 = vmatpush.bf16.msra.mxu2 %v1705_v10 }
  0xd3   :  { %v618_v9 = vpop.f32.mrf.mxu0  ;;  %v632_v13 = vpop.f32.mrf.mxu1 }
  0xd4   :  { %v619_v12 = vadd.f32 %v618_v9, %v2158_v51  ;;  %1205 = vmatpush.bf16.msra.mxu3 %v1777_v14  ;;  %v1227_v14 = vperm.slane %v1225_v6, 0 }
  0xd6   :  { %v633_v17 = vadd.f32 %v632_v13, %v619_v12 }
  0xd7   :  { %1165 = vmatmul.bf16.vlgmr.msra.gmra.mxu0 %v707_v45 }
  0xd8   :  { %v677_v24 = vadd.f32 %v669_v18, %v633_v17  ;;  %1206 = vmatpush.bf16.msra.mxu3 %v1769_v19 }
  0xda   :  { %v693_v30 = vmul.f32 0.2, %v677_v24  ;;  %vm685_vm6 = vcmp.gt.f32.partialorder %v677_v24, 0.0 }
  0xdb   :  { %v646_v34 = vpop.f32.mrf.mxu2  ;;  %v660_v21 = vpop.f32.mrf.mxu3 }
  0xdc   :  { %v647_v20 = vadd.f32 %v646_v34, %v2160_v54  ;;  %v620_v22 = vpop.f32.mrf.mxu0  ;;  %v634_v25 = vpop.f32.mrf.mxu1  ;;  %v701_v37 = vsel %vm685_vm6, %v677_v24, %v693_v30 }
  0xdd   :  { %v621_v51 = vadd.f32 %v620_v22, %v2166_v23 }
  0xde   :  { %v661_v27 = vadd.f32 %v660_v21, %v647_v20 }
  0xdf   :  { %v635_v61 = vadd.f32 %v634_v25, %v621_v51 }
  0xe0   :  { %1179 = vmatmul.bf16.vlgmr.msra.gmra.mxu1 %v708_v63  ;;  %v678_v35 = vadd.f32 %v670_v28, %v661_v27 }
  0xe1   :  { %v681_v31 = vadd.f32 %v669_v18, %v635_v61 }
  0xe2   :  { %v694_v41 = vmul.f32 0.2, %v678_v35  ;;  %vm686_vm8 = vcmp.gt.f32.partialorder %v678_v35, 0.0 }
  0xe3   :  { %vm689_vm7 = vcmp.gt.f32.partialorder %v681_v31, 0.0  ;;  %v697_v32 = vmul.f32 0.2, %v681_v31  ;;  %v648_v33 = vpop.f32.mrf.mxu2  ;;  %v662_v39 = vpop.f32.mrf.mxu3 }
  0xe4   :  { %v649_v54 = vadd.f32 %v648_v33, %v2168_v26  ;;  %v702_v43 = vsel %vm686_vm8, %v678_v35, %v694_v41 }
  0xe5   :  { %v705_v38 = vsel %vm689_vm7, %v681_v31, %v697_v32 }
  0xe6   :  { %v663_v23 = vadd.f32 %v662_v39, %v649_v54  ;;  %v709_v40 = vpack.c.bf16 %v705_v38, %v701_v37  ;;  %v1966_v54 = vld [vmem:[#allocation2] ss:$0 sm:$0xff] }
  0xe8   :  { %v682_v42 = vadd.f32 %v670_v28, %v663_v23  ;;  %1137 = vmatmul.bf16.vlgmr.msrb.gmra.mxu2 %v709_v40 }
  0xea   :  { %vm690_vm9 = vcmp.gt.f32.partialorder %v682_v42, 0.0  ;;  %v698_v36 = vmul.f32 0.2, %v682_v42 }
  0xec   :  { %v706_v44 = vsel %vm690_vm9, %v682_v42, %v698_v36 }
  0xed   :  { %v710_v45 = vpack.c.bf16 %v706_v44, %v702_v43 }
  0xef   :  { %1151 = vmatmul.bf16.vlgmr.msrb.gmra.mxu3 %v710_v45 }
  0xf8   :  { %1193 = vmatmul.bf16.vlgmr.msra.gmra.mxu2 %v709_v40 }
  0xff   :  { %1207 = vmatmul.bf16.vlgmr.msra.gmra.mxu3 %v710_v45 }
 0x144   :  { %v1110_v46 = vpop.f32.mrf.mxu0 }
 0x145   :  { %v1111_v52 = vadd.f32 %v1110_v46, %v777_v2 }
 0x14c   :  { %v1112_v48 = vpop.f32.mrf.mxu0 }
 0x14d   :  { %v1124_v47 = vpop.f32.mrf.mxu1  ;;  %v1113_v63 = vadd.f32 %v1112_v48, %v777_v2 }
 0x14e   :  { %v1125_v55 = vadd.f32 %v1124_v47, %v1111_v52 }
 0x154   :  { %v1166_v53 = vpop.f32.mrf.mxu0 }
 0x155   :  { %v1126_v7 = vpop.f32.mrf.mxu1  ;;  %v1167_v60 = vadd.f32 %v1166_v53, %v778_v29 }
 0x156   :  { %v1127_v1 = vadd.f32 %v1126_v7, %v1113_v63 }
 0x15c   :  { %v1168_v3 = vpop.f32.mrf.mxu0 }
 0x15d   :  { %v1180_v56 = vpop.f32.mrf.mxu1  ;;  %v1169_v12 = vadd.f32 %v1168_v3, %v778_v29 }
 0x15e   :  { %v1181_v0 = vadd.f32 %v1180_v56, %v1167_v60 }
 0x165   :  { %v1182_v13 = vpop.f32.mrf.mxu1 }
 0x166   :  { %v1183_v34 = vadd.f32 %v1182_v13, %v1169_v12 }
 0x16b   :  { %v1138_v26 = vpop.f32.mrf.mxu2 }
 0x16c   :  { %v1139_v58 = vadd.f32 %v1138_v26, %v1125_v55 }
 0x172   :  { %v1152_v11 = vpop.f32.mrf.mxu3 }
 0x173   :  { %v1140_v50 = vpop.f32.mrf.mxu2  ;;  %v1153_v62 = vadd.f32 %v1152_v11, %v1139_v58 }
 0x174   :  { %v1141_v9 = vadd.f32 %v1140_v50, %v1127_v1 }
 0x175   :  { %v1217_v4 = vmul.f32 0.2, %v1153_v62  ;;  %vm1213_vm10 = vcmp.gt.f32.partialorder %v1153_v62, 0.0 }
 0x177   :  { %v1221_v18 = vsel %vm1213_vm10, %v1153_v62, %v1217_v4 }
 0x178   :  { %v1231_v21 = vmul.f32 %v1227_v14, %v1221_v18 }
 0x17a   :  { %v1154_v57 = vpop.f32.mrf.mxu3 }
 0x17b   :  { %v1194_v59 = vpop.f32.mrf.mxu2  ;;  %v1155_v16 = vadd.f32 %v1154_v57, %v1141_v9 }
 0x17c   :  { %v1195_v5 = vadd.f32 %v1194_v59, %v1181_v0 }
 0x17d   :  { %v1219_v24 = vmul.f32 0.2, %v1155_v16  ;;  %vm1215_vm12 = vcmp.gt.f32.partialorder %v1155_v16, 0.0 }
 0x17f   :  { %v1223_v30 = vsel %vm1215_vm12, %v1155_v16, %v1219_v24 }
 0x180   :  { %v1233_v32 = vmul.f32 %v1227_v14, %v1223_v30 }
 0x182   :  { %v1208_v8 = vpop.f32.mrf.mxu3 }
 0x183   :  { %v1209_v10 = vadd.f32 %v1208_v8, %v1195_v5  ;;  %v1196_v19 = vpop.f32.mrf.mxu2 }
 0x184   :  { %v1197_v51 = vadd.f32 %v1196_v19, %v1183_v34 }
 0x185   :  { %vm1214_vm11 = vcmp.gt.f32.partialorder %v1209_v10, 0.0  ;;  %v1218_v17 = vmul.f32 0.2, %v1209_v10 }
 0x187   :  { %v1222_v20 = vsel %vm1214_vm11, %v1209_v10, %v1218_v17 }
 0x188   :  { %v1232_v22 = vmul.f32 %v1228_v15, %v1222_v20 }
 0x18a   :  { %v1210_v25 = vpop.f32.mrf.mxu3  ;;  %v1235_v61 = vadd.f32 %v1232_v22, %v1231_v21 }
 0x18b   :  { %v1211_v27 = vadd.f32 %v1210_v25, %v1197_v51 }
 0x18c   :  { %1236 = vadd.xlane.f32.xlu0 %v1235_v61 }
 0x18d   :  { %vm1216_vm13 = vcmp.gt.f32.partialorder %v1211_v27, 0.0  ;;  %v1220_v28 = vmul.f32 0.2, %v1211_v27 }
 0x18f   :  { %v1224_v31 = vsel %vm1216_vm13, %v1211_v27, %v1220_v28 }
 0x190   :  { %v1234_v33 = vmul.f32 %v1228_v15, %v1224_v31 }
 0x192   :  { %v1238_v35 = vadd.f32 %v1234_v33, %v1233_v32 }
 0x194   :  { %1239 = vadd.xlane.f32.xlu0 %v1238_v35 }
 0x1ff   :  { %v1237_v37 = vpop.xlane.xlu0 %1236 }
 0x200   :  { %v1245_v38 = vadd.f32 %v1966_v54, %v1237_v37 }
 0x202   :  { %v1826_v39 = vmul.f32 -1.442695, %v1245_v38 }
 0x204   :  { %1967 = vpow2.f32 %v1826_v39 }
 0x207   :  { %v1240_v23 = vpop.xlane.xlu0 %1239 }
 0x208   :  { %v1246_v40 = vadd.f32 %v1966_v54, %v1240_v23 }
 0x20a   :  { %v1968_v41 = vpop.eup %1967  ;;  %v1827_v42 = vmul.f32 -1.442695, %v1246_v40 }
 0x20b   :  { %v1253_v36 = vadd.f32 1.0, %v1968_v41 }
 0x20c   :  { %1969 = vpow2.f32 %v1827_v42 }
 0x20d   :  { %1971 = vrcp.f32 %v1253_v36  ;;  %v1266_v26 = vand.u32 2147483648, %v1253_v36  ;;  %v1264_v49 = vand.u32 2147483647, %v1253_v36  ;;  %vm1260_vm15 = vweird.f32 %v1253_v36 }
 0x20f   :  { %v1267_v2 = vor.u32 1.1754944e-38, %v1266_v26  ;;  %vm1265_vm2 = vcmp.eq.f32.partialorder %v1264_v49, 8.507059e+37 }
 0x212   :  { %v1970_v43 = vpop.eup %1969 }
 0x213   :  { %v1972_v44 = vpop.eup %1971  ;;  %v1254_v45 = vadd.f32 1.0, %v1970_v43 }
 0x214   :  { %v1256_v46 = vmul.f32 %v1972_v44, %v1253_v36  ;;  %vm1261_vm14 = vweird.f32 %v1972_v44 }
 0x215   :  { %1973 = vrcp.f32 %v1254_v45  ;;  %vm1262_vm1 = vmor %vm1260_vm15, %vm1261_vm14  ;;  %v1281_v29 = vand.u32 2147483648, %v1254_v45  ;;  %v1279_v57 = vand.u32 2147483647, %v1254_v45  ;;  %vm1275_vm4 = vweird.f32 %v1254_v45 }
 0x216   :  { %v1257_v47 = vsub.f32 1.0, %v1256_v46 }
 0x217   :  { %v1282_v59 = vor.u32 1.1754944e-38, %v1281_v29  ;;  %vm1280_vm6 = vcmp.eq.f32.partialorder %v1279_v57, 8.507059e+37 }
 0x218   :  { %v1258_v48 = vmul.f32 %v1972_v44, %v1257_v47 }
 0x21a   :  { %v1259_v7 = vadd.f32 %v1972_v44, %v1258_v48 }
 0x21b   :  { %v1974_v11 = vpop.eup %1973 }
 0x21c   :  { %v1263_v50 = vsel %vm1262_vm1, %v1972_v44, %v1259_v7  ;;  %v1271_v52 = vmul.f32 %v1974_v11, %v1254_v45  ;;  %vm1276_vm3 = vweird.f32 %v1974_v11 }
 0x21d   :  { %v1268_v53 = vsel %vm1265_vm2, %v1267_v2, %v1263_v50  ;;  %vm1277_vm5 = vmor %vm1275_vm4, %vm1276_vm3 }
 0x21e   :  { %1286 = vst.msk [vmem:[%s2210_s9] sm:$0xff] %vm1285_vm0, %v1268_v53  ;;  %v1272_v55 = vsub.f32 1.0, %v1271_v52 }
 0x220   :  { %v1273_v56 = vmul.f32 %v1974_v11, %v1272_v55 }
 0x222   :  { %v1274_v58 = vadd.f32 %v1974_v11, %v1273_v56 }
 0x224   :  { %v1278_v60 = vsel %vm1277_vm5, %v1974_v11, %v1274_v58 }
 0x225   :  { %v1283_v62 = vsel %vm1280_vm6, %v1282_v59, %v1278_v60 }
 0x226   :  { %1287 = vst.msk [vmem:[%s2210_s9 + $0x8] sm:$0xff] %vm1285_vm0, %v1283_v62 }
 0x227   :  { %1292 = vsyncpa [#allocation4], 1 }
 0x228   :  { %1293 = vsyncpa [#allocation6], 1 }

</bundles_post_ra>
